<compile_context>
chip_gen: v6e
topology: v6e:2x2x1
jax: 0.10.0
libtpu: 0.0.40
codegen_flags: <defaults>
</compile_context>

<pallas_src>
import functools

import jax
import jax.numpy as jnp
from jax.experimental import pallas as pl
from jax.experimental.pallas import tpu as pltpu

BN_EPS = 1e-5
NEG_PAD = -1e30  # pad-lane bias: exp(z_pad - m) == 0, so log-sum-exp is unaffected


# ----------------------------------------------------------------------------
# Kernel (shared by the N=1 path and the batched path)
# ----------------------------------------------------------------------------
def policy_kernel(scalars_ref, x_ref, fcw_ref, out_ref):
    # scalars_ref (SMEM, f32[C+1])        : BN-folded conv weights w'[0..C-1], fused bias b'
    # x_ref       (VMEM, f32[C, Bt, P])   : input feature maps, P = H*W
    # fcw_ref     (VMEM, bf16[P+8, OUTP]) : rows [0:P] = fc_w.T, row P = fc bias
    #                                       (bias pad lanes = -1e30), OUTP lane-padded to 128
    # out_ref     (VMEM, f32[Bt, OUTP])   : log-softmax output (pad lanes garbage, sliced off)
    C = x_ref.shape[0]
    P = x_ref.shape[-1]

    # 1x1 conv + conv bias + eval-mode BN folded into a VPU weighted channel sum
    # (K=C=4 would use <1% of the MXU; unrolled VALU muls/adds keep the
    #  vector-extended slot free for the fc matmul). Stays f32 (v5e-safe).
    h = scalars_ref[0] * x_ref[0]
    for c in range(1, C):
        h = h + scalars_ref[c] * x_ref[c]
    h = jnp.maximum(h + scalars_ref[C], 0.0)                       # ReLU

    # fully connected on the MXU: (Bt,P) @ (P,OUT_PAD) in bf16, f32 accumulate,
    # then add the bias row (static ref slices are free).
    z = jnp.dot(h.astype(fcw_ref.dtype), fcw_ref[0:P, :],
                preferred_element_type=jnp.float32)
    z = z + fcw_ref[P:P + 1, :].astype(jnp.float32)

    # log_softmax over the lane axis; pad lanes carry -1e30 so they contribute
    # nothing to the max / sum.
    m = jnp.max(z, axis=-1, keepdims=True)
    e = jnp.exp(z - m)
    lse = jnp.log(jnp.sum(e, axis=-1, keepdims=True)) + m
    out_ref[...] = z - lse


# ----------------------------------------------------------------------------
# One-time parameter prep (BN folding, transpose, lane padding, bf16 cast)
# ----------------------------------------------------------------------------
def prepare_params(params):
    conv_w = params["conv_w"].reshape(-1).astype(jnp.float32)        # (C,)
    conv_b = params["conv_b"].reshape(()).astype(jnp.float32)
    gamma = params["bn_gamma"].reshape(()).astype(jnp.float32)
    beta = params["bn_beta"].reshape(()).astype(jnp.float32)
    mean = params["bn_mean"].reshape(()).astype(jnp.float32)
    var = params["bn_var"].reshape(()).astype(jnp.float32)

    scale = gamma * jax.lax.rsqrt(var + BN_EPS)
    w_fold = scale * conv_w                                          # (C,)
    b_fold = scale * (conv_b - mean) + beta                          # ()
    scalars = jnp.concatenate([w_fold, b_fold[None]]).astype(jnp.float32)  # (C+1,)

    fc_w = params["fc_w"].astype(jnp.float32)                        # (OUT, P)
    fc_b = params["fc_b"].astype(jnp.float32)                        # (OUT,)
    out_dim, p = fc_w.shape
    out_pad = ((out_dim + 127) // 128) * 128                         # lane-dense output

    # merged weight + bias slab: rows [0:P] = W^T, row P = bias, rest = padding
    slab = jnp.zeros((p + 8, out_pad), jnp.float32)
    slab = slab.at[:p, :out_dim].set(fc_w.T)
    slab = slab.at[p, :].set(NEG_PAD)
    slab = slab.at[p, :out_dim].set(fc_b)
    fcw = slab.astype(jnp.bfloat16)                                  # halves the biggest DMA

    return {"scalars": scalars, "fcw": fcw,
            "out": int(out_dim), "out_pad": int(out_pad), "p": int(p)}


# ----------------------------------------------------------------------------
# Hot paths (jitted: reshape + pallas_call + slice fuse into one dispatch)
# ----------------------------------------------------------------------------
@functools.partial(jax.jit, static_argnames=("out_dim",))
def _forward_single_jit(x_nchw, scalars, fcw, *, out_dim):
    N, C, H, W = x_nchw.shape
    assert N == 1, "PolicyNet.forward flattens the batch; only N=1 is well-defined"
    P = H * W
    assert fcw.shape[0] == P + 8, "fc expects outplanes-1 == H*W features"
    out_pad = fcw.shape[1]

    x_cbp = x_nchw.astype(jnp.float32).reshape(C, 1, P)

    out = pl.pallas_call(
        policy_kernel,
        out_shape=jax.ShapeDtypeStruct((1, out_pad), jnp.float32),
        in_specs=[
            pl.BlockSpec(memory_space=pltpu.MemorySpace.SMEM),   # fused scalars (C+1,)
            pl.BlockSpec(memory_space=pltpu.MemorySpace.VMEM),   # x (C, 1, P)
            pl.BlockSpec(memory_space=pltpu.MemorySpace.VMEM),   # weight+bias slab (P+8, OUT_PAD)
        ],
        out_specs=pl.BlockSpec(memory_space=pltpu.MemorySpace.VMEM),
        cost_estimate=pl.CostEstimate(
            flops=2 * P * out_pad,
            transcendentals=out_pad,
            bytes_accessed=4 * (C + 1) + 4 * C * P + 2 * (P + 8) * out_pad + 4 * out_pad),
    )(scalars, x_cbp, fcw)
    return out[0, :out_dim]


@functools.partial(jax.jit, static_argnames=("out_dim", "b_tile"))
def _forward_batched_jit(x_nchw, scalars, fcw, *, out_dim, b_tile=128):
    B, C, H, W = x_nchw.shape
    P = H * W
    assert fcw.shape[0] == P + 8, "fc expects outplanes-1 == H*W features"
    out_pad = fcw.shape[1]

    n_tiles = (B + b_tile - 1) // b_tile
    b_padded = n_tiles * b_tile

    # (B, C, H, W) -> (C, B, P) so each grid step gets a dense (C, B_tile, P) slab
    x_cbp = jnp.transpose(x_nchw.astype(jnp.float32).reshape(B, C, P), (1, 0, 2))
    if b_padded != B:
        x_cbp = jnp.pad(x_cbp, ((0, 0), (0, b_padded - B), (0, 0)))

    out = pl.pallas_call(
        policy_kernel,
        out_shape=jax.ShapeDtypeStruct((b_padded, out_pad), jnp.float32),
        grid=(n_tiles,),
        in_specs=[
            pl.BlockSpec(memory_space=pltpu.MemorySpace.SMEM),          # scalars, whole array
            pl.BlockSpec((C, b_tile, P), lambda i: (0, i, 0)),          # x tile over batch
            pl.BlockSpec((P + 8, out_pad), lambda i: (0, 0)),           # resident weight slab
        ],
        out_specs=pl.BlockSpec((b_tile, out_pad), lambda i: (i, 0)),
        compiler_params=pltpu.CompilerParams(
            dimension_semantics=("parallel",)),                         # both TCs on v7x
        cost_estimate=pl.CostEstimate(
            flops=2 * b_padded * P * out_pad,
            transcendentals=b_padded * out_pad,
            bytes_accessed=4 * (C + 1) + 4 * C * b_padded * P
            + 2 * (P + 8) * out_pad + 4 * b_padded * out_pad),
    )(scalars, x_cbp, fcw)
    return out[:B, :out_dim]


def policy_net_forward_prepared(x_nchw, prep):
    """Latency path (N=1): one jitted dispatch."""
    return _forward_single_jit(x_nchw, prep["scalars"], prep["fcw"], out_dim=prep["out"])


def policy_net_forward_batched_prepared(x_bchw, prep, b_tile=128):
    """Throughput path: independent positions, parallel grid over the batch.
    b_tile=128 matches the v5e MXU; 256 is preferred on v6e/v7x."""
    return _forward_batched_jit(x_bchw, prep["scalars"], prep["fcw"],
                                out_dim=prep["out"], b_tile=b_tile)


def policy_net_forward(x_nchw, params):
    """Convenience wrapper: prep + forward (prep should normally be cached)."""
    return policy_net_forward_prepared(x_nchw, prepare_params(params))


# ----------------------------------------------------------------------------
# Pure-JAX reference (f32), replicating PolicyNet.forward per position
# ----------------------------------------------------------------------------
def reference_forward_batch(x_bchw, params):
    B, C, H, W = x_bchw.shape
    x = x_bchw.astype(jnp.float32)
    y = jnp.einsum("bchw,c->bhw", x, params["conv_w"].reshape(C)) + params["conv_b"].reshape(())
    scale = params["bn_gamma"].reshape(()) * jax.lax.rsqrt(params["bn_var"].reshape(()) + BN_EPS)
    y = (y - params["bn_mean"].reshape(())) * scale + params["bn_beta"].reshape(())
    y = jnp.maximum(y, 0.0).reshape(B, H * W)            # per-position x.view(-1)
    z = y @ params["fc_w"].T + params["fc_b"]            # Linear(outplanes-1, outplanes)
    return jax.nn.log_softmax(z, axis=-1)


def init_params(key, inplanes, outplanes):
    k = jax.random.split(key, 6)
    feat = outplanes - 1
    return {
        "conv_w": 0.2 * jax.random.normal(k[0], (1, inplanes, 1, 1), jnp.float32),
        "conv_b": 0.1 * jax.random.normal(k[1], (1,), jnp.float32),
        "bn_gamma": jnp.ones((1,), jnp.float32) + 0.1 * jax.random.normal(k[2], (1,), jnp.float32),
        "bn_beta": 0.1 * jax.random.normal(k[3], (1,), jnp.float32),
        "bn_mean": 0.05 * jax.random.normal(k[4], (1,), jnp.float32),
        "bn_var": jnp.ones((1,), jnp.float32) * 0.9,
        "fc_w": 0.1 * jax.random.normal(k[5], (outplanes, feat), jnp.float32),
        "fc_b": jnp.linspace(-0.1, 0.1, outplanes, dtype=jnp.float32),
    }


if __name__ == "__main__":
    inplanes = 4
    board = 8                      # board N=8 -> H=W=8
    outplanes = board * board + 1  # 65, Linear(64 -> 65)

    key = jax.random.PRNGKey(0)
    pkey, xkey, bkey = jax.random.split(key, 3)
    params = init_params(pkey, inplanes, outplanes)

    # one-time parameter prep (BN folding, transpose, lane padding, bf16 cast)
    prep = prepare_params(params)
    prep = {k: (jax.block_until_ready(v) if isinstance(v, jax.Array) else v)
            for k, v in prep.items()}

    # --- N=1 latency path ----------------------------------------------------
    x1 = jax.random.normal(xkey, (1, inplanes, board, board), jnp.float32)  # NCHW
    probas = jax.block_until_ready(policy_net_forward_prepared(x1, prep))
    ref1 = reference_forward_batch(x1, params)[0]
    assert probas.shape == (outplanes,)
    # bf16 fc weights -> loosened tolerance vs f32 reference
    assert jnp.allclose(probas, ref1, atol=3e-2, rtol=1e-2), "N=1 mismatch vs reference"
    assert jnp.allclose(jnp.sum(jnp.exp(probas)), 1.0, atol=1e-3)

    # --- batched throughput path (parallel grid over the batch) --------------
    B = 200  # non-multiple of b_tile to exercise batch padding
    xb = jax.random.normal(bkey, (B, inplanes, board, board), jnp.float32)
    probas_b = jax.block_until_ready(policy_net_forward_batched_prepared(xb, prep, b_tile=128))
    refb = reference_forward_batch(xb, params)
    assert probas_b.shape == (B, outplanes)
    assert jnp.allclose(probas_b, refb, atol=3e-2, rtol=1e-2), "batched mismatch vs reference"
    assert jnp.allclose(jnp.sum(jnp.exp(probas_b), axis=-1), jnp.ones((B,)), atol=1e-3)

    print("KERNEL_OK")
</pallas_src>

<mosaic_0001>
module attributes {stable_mosaic.version = 11 : i64} {
  func.func @policy_kernel(%arg0: memref<5xf32, #tpu.memory_space<smem>>, %arg1: memref<4x1x64xf32, #tpu.memory_space<vmem>>, %arg2: memref<72x128xbf16, #tpu.memory_space<vmem>>, %arg3: memref<1x128xf32, #tpu.memory_space<vmem>>) attributes {dimension_semantics = [], scalar_prefetch = 0 : i64, scratch_operands = 0 : i64, tpu.core_type = #tpu.core_type<tc>} {
    %c0 = arith.constant 0 : index
    %0 = memref.load %arg0[%c0] : memref<5xf32, #tpu.memory_space<smem>>
    %c0_0 = arith.constant 0 : index
    %c0_1 = arith.constant 0 : index
    %c0_2 = arith.constant 0 : index
    %1 = vector.load %arg1[%c0_0, %c0_1, %c0_2] : memref<4x1x64xf32, #tpu.memory_space<vmem>>, vector<1x1x64xf32>
    %2 = vector.shape_cast %1 : vector<1x1x64xf32> to vector<1x64xf32>
    %3 = vector.broadcast %0 : f32 to vector<1x64xf32>
    %4 = arith.mulf %3, %2 : vector<1x64xf32>
    %c1 = arith.constant 1 : index
    %5 = memref.load %arg0[%c1] : memref<5xf32, #tpu.memory_space<smem>>
    %c1_3 = arith.constant 1 : index
    %c0_4 = arith.constant 0 : index
    %c0_5 = arith.constant 0 : index
    %6 = vector.load %arg1[%c1_3, %c0_4, %c0_5] : memref<4x1x64xf32, #tpu.memory_space<vmem>>, vector<1x1x64xf32>
    %7 = vector.shape_cast %6 : vector<1x1x64xf32> to vector<1x64xf32>
    %8 = vector.broadcast %5 : f32 to vector<1x64xf32>
    %9 = arith.mulf %8, %7 : vector<1x64xf32>
    %10 = arith.addf %4, %9 : vector<1x64xf32>
    %c2 = arith.constant 2 : index
    %11 = memref.load %arg0[%c2] : memref<5xf32, #tpu.memory_space<smem>>
    %c2_6 = arith.constant 2 : index
    %c0_7 = arith.constant 0 : index
    %c0_8 = arith.constant 0 : index
    %12 = vector.load %arg1[%c2_6, %c0_7, %c0_8] : memref<4x1x64xf32, #tpu.memory_space<vmem>>, vector<1x1x64xf32>
    %13 = vector.shape_cast %12 : vector<1x1x64xf32> to vector<1x64xf32>
    %14 = vector.broadcast %11 : f32 to vector<1x64xf32>
    %15 = arith.mulf %14, %13 : vector<1x64xf32>
    %16 = arith.addf %10, %15 : vector<1x64xf32>
    %c3 = arith.constant 3 : index
    %17 = memref.load %arg0[%c3] : memref<5xf32, #tpu.memory_space<smem>>
    %c3_9 = arith.constant 3 : index
    %c0_10 = arith.constant 0 : index
    %c0_11 = arith.constant 0 : index
    %18 = vector.load %arg1[%c3_9, %c0_10, %c0_11] : memref<4x1x64xf32, #tpu.memory_space<vmem>>, vector<1x1x64xf32>
    %19 = vector.shape_cast %18 : vector<1x1x64xf32> to vector<1x64xf32>
    %20 = vector.broadcast %17 : f32 to vector<1x64xf32>
    %21 = arith.mulf %20, %19 : vector<1x64xf32>
    %22 = arith.addf %16, %21 : vector<1x64xf32>
    %c4 = arith.constant 4 : index
    %23 = memref.load %arg0[%c4] : memref<5xf32, #tpu.memory_space<smem>>
    %24 = vector.broadcast %23 : f32 to vector<1x64xf32>
    %25 = arith.addf %22, %24 : vector<1x64xf32>
    %cst = arith.constant 0.000000e+00 : f32
    %26 = vector.broadcast %cst : f32 to vector<1x64xf32>
    %27 = arith.maximumf %25, %26 : vector<1x64xf32>
    %28 = arith.truncf %27 : vector<1x64xf32> to vector<1x64xbf16>
    %c0_12 = arith.constant 0 : index
    %c0_13 = arith.constant 0 : index
    %29 = vector.load %arg2[%c0_12, %c0_13] : memref<72x128xbf16, #tpu.memory_space<vmem>>, vector<64x128xbf16>
    %cst_14 = arith.constant dense<0.000000e+00> : vector<1x128xf32>
    %30 = tpu.matmul %28, %29, %cst_14 {dimension_numbers = #tpu.dot_dimension_numbers<[1], [0], [0], [1], [0, 0, 1, 1], [], []>} : vector<1x64xbf16>, vector<64x128xbf16>, vector<1x128xf32> -> vector<1x128xf32>
    %c64 = arith.constant 64 : index
    %c0_15 = arith.constant 0 : index
    %31 = vector.load %arg2[%c64, %c0_15] : memref<72x128xbf16, #tpu.memory_space<vmem>>, vector<1x128xbf16>
    %32 = arith.extf %31 : vector<1x128xbf16> to vector<1x128xf32>
    %33 = arith.addf %30, %32 : vector<1x128xf32>
    %cst_16 = arith.constant dense<0xFF800000> : vector<1xf32>
    %34 = vector.multi_reduction <maximumf>, %33, %cst_16 [1] : vector<1x128xf32> to vector<1xf32>
    %35 = vector.shape_cast %34 : vector<1xf32> to vector<1x1xf32>
    %36 = vector.broadcast %35 : vector<1x1xf32> to vector<1x128xf32>
    %37 = arith.subf %33, %36 : vector<1x128xf32>
    %38 = math.exp %37 : vector<1x128xf32>
    %cst_17 = arith.constant dense<0.000000e+00> : vector<1xf32>
    %39 = vector.multi_reduction <add>, %38, %cst_17 [1] : vector<1x128xf32> to vector<1xf32>
    %40 = vector.shape_cast %39 : vector<1xf32> to vector<1x1xf32>
    %41 = math.log %40 : vector<1x1xf32>
    %42 = arith.addf %41, %35 : vector<1x1xf32>
    %43 = vector.broadcast %42 : vector<1x1xf32> to vector<1x128xf32>
    %44 = arith.subf %33, %43 : vector<1x128xf32>
    %c0_18 = arith.constant 0 : index
    %c0_19 = arith.constant 0 : index
    %45 = vector.load %arg3[%c0_18, %c0_19] : memref<1x128xf32, #tpu.memory_space<vmem>>, vector<1x128xf32>
    tpu.vector_store %arg3[%c0_18, %c0_19], %44 {strides = array<i32>} : memref<1x128xf32, #tpu.memory_space<vmem>>, vector<1x128xf32>,
    return
  }
}

</mosaic_0001>

<bundles_post_ra>
// kernel: _forward_single_jit.1
= control target key start
LH: loop header
LB: loop body
LE: loop exit
PB: predicated region body
PF: predicated region fallthrough
CT: control target
= control target key end

     0   :  { %8 = vsyncpa [#allocation3], 0  ;;  %s263_s0 = inlined_call_operand.vmem [shape: f32[5], index: 0, kind: input, shape index: {}]   ;;  %s264_s1 = inlined_call_operand.vmem [shape: f32[4,1,64], index: 1, kind: input, shape index: {}]   ;;  %s265_s2 = inlined_call_operand.vmem [shape: bf16[72,128], index: 2, kind: input, shape index: {}]   ;;  %s266_s3 = inlined_call_operand.vmem [shape: f32[1,128], index: 3, kind: output, shape index: {}]  }
   0x1   :  { %s15_s14 = sshll.u32 %s263_s0, 4  ;;  %s16_s14 = int_to_ptr.vmem [resolvable:$true] %s15_s14 }
   0x2   :  { %s193_s15 = scalar_lea.vmem %s16_s14, 16  ;;  %p198_p1 = scmp.lt.s32.totalorder %s16_s14, %s16_s14 }
   0x3   :  { %p194_p0 = scmp.ne.s32.totalorder %s16_s14, %s193_s15  ;;  %p199_p2 = scmp.lt.s32.totalorder %s193_s15, %s193_s15 }
   0x5   :  { %p200_p3 = por %p199_p2, %p198_p1 }
   0x7   :  { %p201_p4 = pnand %p200_p3, %p194_p0 }
   0x9   :  { %204 = shalt.err (!%p201_p4)
}
   0xa   :  { %s207_s16 = smov [#allocation2]  }
   0xb   :  { %18 = dma.vmem_to_smem %s16_s14, 16, %s207_s16, [#allocation3]  }
   0xc   :  { %205 = dma.done.wait [#allocation3], 16  }
   0xd   :  { %206 = vsyncadd [#allocation3], 4294967280 }
   0xe   :  { %26 = sfence }
   0xf   :  { %v185_v0 = vld [vmem:[%s265_s2 + $0x18] sm:$0xff]   ;;  %v208_v1 = vmov 0.0   ;;  %v186_v2 = vld [vmem:[%s265_s2 + $0x10] sm:$0xff]   ;;  %vm209_vm0 = vmmov 0   ;;  %s28_s20 = sld [smem:[#allocation2]]  ;;  %v187_v3 = vld [vmem:[%s265_s2 + $0x8] sm:$0xff]  }
  0x10   :  { %170 = vmatprep.subr.bf16.mxu0 %v208_v1  ;;  %178 = vmatprep.mubr.msk.bf16.mxu0 %vm209_vm0, %v208_v1  ;;  %s153_s21 = sld [smem:[#allocation2 + $0x1]]  ;;  %v29_v4 = vld [vmem:[%s264_s1] sm:$0x1]  ;;  %v154_v5 = vld [vmem:[%s264_s1 + $0x1] sm:$0x1]  ;;  %vm89_vm1 = vcmask 523264  }
  0x11   :  { %171 = vmatpush3.bf16.msra.mxu0 %v185_v0  ;;  %s155_s24 = sld [smem:[#allocation2 + $0x2]]  ;;  %v188_v6 = vld [vmem:[%s265_s2] sm:$0xff]   ;;  %vm133_vm2 = vcmask 1040384  }
  0x12   :  { %172 = vmatprep.subr.bf16.mxu0 %v208_v1  ;;  %s157_s25 = sld [smem:[#allocation2 + $0x3]]  ;;  %v156_v8 = vld [vmem:[%s264_s1 + $0x2] sm:$0x1]  ;;  %v158_v11 = vld [vmem:[%s264_s1 + $0x3] sm:$0x1] }
  0x13   :  { %s159_s30 = sld [smem:[#allocation2 + $0x4]]  ;;  %v63_v24 = vld [vmem:[%s265_s2 + $0x20] sm:$0x1] }
  0x14   :  { %v64_v25 = vunpack.c.l.bf16 %v63_v24 }
  0x15   :  { %173 = vmatpush3.bf16.msra.mxu0 %v186_v2  ;;  %v30_v7 = vstv %s28_s20 }
  0x16   :  { %174 = vmatprep.subr.bf16.mxu0 %v208_v1  ;;  %v31_v9 = vmul.f32 %v30_v7, %v29_v4  ;;  %v35_v10 = vstv %s153_s21 }
  0x17   :  { %v36_v12 = vmul.f32 %v154_v5, %v35_v10  ;;  %v41_v13 = vstv %s155_s24 }
  0x18   :  { %v42_v14 = vmul.f32 %v156_v8, %v41_v13  ;;  %v47_v15 = vstv %s157_s25 }
  0x19   :  { %175 = vmatpush3.bf16.msra.mxu0 %v187_v3  ;;  %v37_v16 = vadd.f32 %v36_v12, %v31_v9  ;;  %v48_v17 = vmul.f32 %v158_v11, %v47_v15  ;;  %v51_v19 = vstv %s159_s30 }
  0x1a   :  { %176 = vmatprep.subr.bf16.mxu0 %v208_v1 }
  0x1b   :  { %v43_v18 = vadd.f32 %v42_v14, %v37_v16 }
  0x1d   :  { %177 = vmatpush3.bf16.msra.mxu0 %v188_v6  ;;  %v49_v20 = vadd.f32 %v48_v17, %v43_v18 }
  0x1f   :  { %v52_v21 = vadd.f32 %v51_v19, %v49_v20 }
  0x21   :  { %v53_v22 = vmax.f32 %v52_v21, 0.0 }
  0x23   :  { %v54_v23 = vpack.c.bf16 %v53_v22, %v53_v22 }
  0x25   :  { %179 = vmatmul.mubr.msk.bf16.vlgmr.msra.gmra.mxu0 %vm89_vm1, %v54_v23 }
  0xe5   :  { %v127_v26 = vpop.f32.mrf.mxu0 }
  0xe6   :  { %v128_v27 = vadd.f32 %v127_v26, %v64_v25 }
  0xe7   :  { %v180_v28 = vpop.f32.mrf.mxu0 }
  0xe8   :  { %v134_v29 = vsel %vm133_vm2, %v128_v27, -inf }
  0xe9   :  { %135 = vmax.xlane.f32.xlu0 %v134_v29  ;;  %v130_v30 = vpop.f32.mrf.mxu0 }
  0xeb   :  { %v181_v31 = vpop.f32.mrf.mxu0 }
 0x172   :  { %v136_v32 = vpop.xlane.xlu0 %135 }
 0x173   :  { %v137_v33 = vsub.f32 %v128_v27, %v136_v32 }
 0x175   :  { %v138_v34 = vmul.f32 1.442695, %v137_v33 }
 0x177   :  { %189 = vpow2.f32 %v138_v34 }
 0x184   :  { %v190_v35 = vpop.eup %189 }
 0x185   :  { %v140_v36 = vsel %vm133_vm2, %v190_v35, 0.0 }
 0x186   :  { %141 = vadd.xlane.f32.xlu0 %v140_v36 }
 0x20f   :  { %v142_v37 = vpop.xlane.xlu0 %141 }
 0x210   :  { %191 = vlog2.f32 %v142_v37 }
 0x21d   :  { %v192_v38 = vpop.eup %191 }
 0x21e   :  { %v144_v39 = vmul.f32 0.6931472, %v192_v38 }
 0x220   :  { %v145_v40 = vadd.f32 %v144_v39, %v136_v32 }
 0x222   :  { %v146_v41 = vsub.f32 %v128_v27, %v145_v40 }
 0x224   :  { %147 = vst [vmem:[%s266_s3] sm:$0x1] %v146_v41 }
 0x225   :  { %152 = vsyncpa [#allocation3], 1 }

</bundles_post_ra>
